<compile_context>
chip_gen: v6e
topology: v6e:2x2x1
jax: 0.10.0
libtpu: 0.0.40
codegen_flags: <defaults>
</compile_context>

<pallas_src>
import jax
import jax.numpy as jnp
from jax.experimental import pallas as pl
from jax.experimental.pallas import tpu as pltpu

IN_FEATURES = 2
OUT_FEATURES = 1

_SUBLANES = 8                   # f32 sublanes per vreg
_LANES = 128                    # lanes per vreg
_PACK = _SUBLANES * _LANES      # batch padding granularity (1024)

_MAX_BLOCK_COLS = 32 * 1024     # 32768 lanes/block -> 256K batch elems/step,
                                # ~6 MiB double-buffered VMEM (fits all chips)
_MIN_GRID_STEPS = 8             # keep >= 8 steps at large B (v7x 2-TC sharding)
_FAST_PATH_MAX_BATCH = 8192     # below this, plain XLA beats kernel launch cost


def _round_up(n, m):
    return ((n + m - 1) // m) * m


def _linear_kernel(w_ref, b_ref, xp_ref, op_ref):
    """y = x @ W.T + b for W: (1, 2), computed as two VPU multiply-adds.

    w_ref : (1, 2)   SMEM   nn.Linear weight (native PyTorch layout)
    b_ref : (1,)     SMEM   nn.Linear bias
    xp_ref: (16, bt) VMEM   rows 0-7 = feature 0, rows 8-15 = feature 1
    op_ref: (8,  bt) VMEM   packed output (same batch layout as each feature slab)
    """
    w0 = w_ref[0, 0]
    w1 = w_ref[0, 1]
    b = b_ref[0]
    x0 = xp_ref[0:_SUBLANES, :]                # (8, bt) feature 0 (aligned slice)
    x1 = xp_ref[_SUBLANES:2 * _SUBLANES, :]    # (8, bt) feature 1 (aligned slice)
    op_ref[...] = x0 * w0 + x1 * w1 + b        # pure VPU, fully dense vregs


def linear_pallas(x, weight, bias):
    """Pallas path (always runs the kernel). x: (B, 2) f32 -> (B, 1) f32."""
    B = x.shape[0]
    assert x.shape == (B, IN_FEATURES)
    assert weight.shape == (OUT_FEATURES, IN_FEATURES)
    assert bias.shape == (OUT_FEATURES,)

    # Pad batch to a multiple of 1024 so the packed layout is (8,128)-aligned.
    Bp = _round_up(B, _PACK)
    x_pad = x if Bp == B else jnp.pad(x, ((0, Bp - B), (0, 0)))
    cols = Bp // _SUBLANES

    # Pack: (B,2) -> feature-major (2,Bp) -> (16, cols). One XLA layout copy.
    x_packed = x_pad.T.reshape(IN_FEATURES * _SUBLANES, cols)

    # Block size along the packed column axis: as large as possible (amortize
    # the ~0.35 us/step pipeline overhead) but capped so (a) VMEM stays ~6 MiB
    # double-buffered and (b) large B still yields >= _MIN_GRID_STEPS steps.
    bt = min(_MAX_BLOCK_COLS,
             _round_up(pl.cdiv(cols, _MIN_GRID_STEPS), _LANES),
             cols)
    grid = (pl.cdiv(cols, bt),)

    flops = 2 * B * IN_FEATURES * OUT_FEATURES
    bytes_accessed = 4 * (B * IN_FEATURES + B * OUT_FEATURES
                          + IN_FEATURES * OUT_FEATURES + OUT_FEATURES)

    out_packed = pl.pallas_call(
        _linear_kernel,
        out_shape=jax.ShapeDtypeStruct(
            (_SUBLANES * OUT_FEATURES, cols), jnp.float32),
        grid_spec=pltpu.PrefetchScalarGridSpec(
            num_scalar_prefetch=0,
            grid=grid,
            in_specs=[
                # tiny operands -> SMEM scalars, no VMEM tiles / DMAs
                pl.BlockSpec(memory_space=pltpu.MemorySpace.SMEM),   # weight (1,2)
                pl.BlockSpec(memory_space=pltpu.MemorySpace.SMEM),   # bias (1,)
                # packed activation streamed in dense (16, bt) tiles
                pl.BlockSpec((IN_FEATURES * _SUBLANES, bt), lambda i: (0, i)),
            ],
            out_specs=pl.BlockSpec((_SUBLANES * OUT_FEATURES, bt),
                                   lambda i: (0, i)),
        ),
        compiler_params=pltpu.CompilerParams(
            dimension_semantics=("parallel",),
            vmem_limit_bytes=32 * 1024 * 1024,
        ),
        cost_estimate=pl.CostEstimate(
            flops=flops, transcendentals=0, bytes_accessed=bytes_accessed),
    )(weight, bias, x_packed)

    # (8, cols) row-major flat index == batch index: free reshape + de-pad slice.
    y = out_packed.reshape(Bp, OUT_FEATURES)
    return y if Bp == B else y[:B]


def simple_model_forward(x, weight, bias):
    """_SimpleModel.forward == nn.Linear(2, 1). Small batches take a pure-XLA
    fast path (kernel launch + the repack copy dominate in that regime)."""
    if x.shape[0] < _FAST_PATH_MAX_BATCH:
        return x @ weight.T + bias
    return linear_pallas(x, weight, bias)


if __name__ == "__main__":
    key = jax.random.PRNGKey(0)
    k_w, k_b, k_small, k_mid, k_big = jax.random.split(key, 5)

    # PyTorch nn.Linear default init: U(-1/sqrt(in), 1/sqrt(in))
    bound = 1.0 / (IN_FEATURES ** 0.5)
    weight = jax.random.uniform(
        k_w, (OUT_FEATURES, IN_FEATURES), jnp.float32, -bound, bound)
    bias = jax.random.uniform(
        k_b, (OUT_FEATURES,), jnp.float32, -bound, bound)

    def ref(xv):
        return xv @ weight.T + bias

    # 1) tiny batch through the public wrapper (pure-XLA fast path)
    x_small = jax.random.normal(k_small, (8, IN_FEATURES), jnp.float32)
    y_small = simple_model_forward(x_small, weight, bias)

    # 2) ragged batch (not a multiple of 8 or 128) forced through the kernel:
    #    exercises batch padding, a multi-step grid, and a partial last block.
    x_mid = jax.random.normal(k_mid, (4500, IN_FEATURES), jnp.float32)
    y_mid = linear_pallas(x_mid, weight, bias)

    # 3) pad-free batch routed through the wrapper's Pallas path.
    x_big = jax.random.normal(k_big, (9216, IN_FEATURES), jnp.float32)
    y_big = simple_model_forward(x_big, weight, bias)

    jax.block_until_ready((y_small, y_mid, y_big))

    for y, xv in ((y_small, x_small), (y_mid, x_mid), (y_big, x_big)):
        assert y.shape == (xv.shape[0], OUT_FEATURES)
        assert jnp.allclose(y, ref(xv), atol=1e-5, rtol=1e-5)
    print("KERNEL_OK")
</pallas_src>

<mosaic_0001>
module attributes {stable_mosaic.version = 11 : i64} {
  func.func @_linear_kernel(%arg0: i32, %arg1: memref<1x2xf32, #tpu.memory_space<smem>>, %arg2: memref<1xf32, #tpu.memory_space<smem>>, %arg3: memref<16x128xf32, #tpu.memory_space<vmem>>, %arg4: memref<8x128xf32, #tpu.memory_space<vmem>>) attributes {dimension_semantics = [#tpu.dimension_semantics<parallel>], iteration_bounds = array<i64: 5>, scalar_prefetch = 0 : i64, scratch_operands = 0 : i64, tpu.core_type = #tpu.core_type<tc>, window_params = [{transform_indices = @transform_0, window_bounds = array<i64: 1, 2>}, {transform_indices = @transform_1, window_bounds = array<i64: 1>}, {transform_indices = @transform_2, window_bounds = array<i64: 16, 128>}, {transform_indices = @transform_3, window_bounds = array<i64: 8, 128>}]} {
    %c0 = arith.constant 0 : index
    %c0_0 = arith.constant 0 : index
    %0 = memref.load %arg1[%c0, %c0_0] : memref<1x2xf32, #tpu.memory_space<smem>>
    %c0_1 = arith.constant 0 : index
    %c1 = arith.constant 1 : index
    %1 = memref.load %arg1[%c0_1, %c1] : memref<1x2xf32, #tpu.memory_space<smem>>
    %c0_2 = arith.constant 0 : index
    %2 = memref.load %arg2[%c0_2] : memref<1xf32, #tpu.memory_space<smem>>
    %c0_3 = arith.constant 0 : index
    %c0_4 = arith.constant 0 : index
    %3 = vector.load %arg3[%c0_3, %c0_4] : memref<16x128xf32, #tpu.memory_space<vmem>>, vector<8x128xf32>
    %c8 = arith.constant 8 : index
    %c0_5 = arith.constant 0 : index
    %4 = vector.load %arg3[%c8, %c0_5] : memref<16x128xf32, #tpu.memory_space<vmem>>, vector<8x128xf32>
    %5 = vector.broadcast %0 : f32 to vector<8x128xf32>
    %6 = arith.mulf %3, %5 : vector<8x128xf32>
    %7 = vector.broadcast %1 : f32 to vector<8x128xf32>
    %8 = arith.mulf %4, %7 : vector<8x128xf32>
    %9 = arith.addf %6, %8 : vector<8x128xf32>
    %10 = vector.broadcast %2 : f32 to vector<8x128xf32>
    %11 = arith.addf %9, %10 : vector<8x128xf32>
    %c0_6 = arith.constant 0 : index
    %c0_7 = arith.constant 0 : index
    %12 = vector.load %arg4[%c0_6, %c0_7] : memref<8x128xf32, #tpu.memory_space<vmem>>, vector<8x128xf32>
    tpu.vector_store %arg4[%c0_6, %c0_7], %11 {strides = array<i32>} : memref<8x128xf32, #tpu.memory_space<vmem>>, vector<8x128xf32>,
    return
  }
  func.func @transform_0(%arg0: i32) -> (i32, i32) {
    %c0_i32 = arith.constant 0 : i32
    %c0_i32_0 = arith.constant 0 : i32
    %c0_i32_1 = arith.constant 0 : i32
    return %c0_i32, %c0_i32_0 : i32, i32
  }
  func.func @transform_1(%arg0: i32) -> i32 {
    %c0_i32 = arith.constant 0 : i32
    %c0_i32_0 = arith.constant 0 : i32
    return %c0_i32 : i32
  }
  func.func @transform_2(%arg0: i32) -> (i32, i32) {
    %c0_i32 = arith.constant 0 : i32
    %c0_i32_0 = arith.constant 0 : i32
    return %c0_i32, %arg0 : i32, i32
  }
  func.func @transform_3(%arg0: i32) -> (i32, i32) {
    %c0_i32 = arith.constant 0 : i32
    %c0_i32_0 = arith.constant 0 : i32
    return %c0_i32, %arg0 : i32, i32
  }
}

</mosaic_0001>

<bundles_post_ra>
// kernel: tpu_custom_call.1
= control target key start
LH: loop header
LB: loop body
LE: loop exit
PB: predicated region body
PF: predicated region fallthrough
CT: control target
= control target key end

     0   :  { %s701_s0 = inlined_call_operand.vmem [shape: f32[1,2], index: 0, kind: input, shape index: {}]   ;;  %s702_s1 = inlined_call_operand.<no memory space> [shape: f32[1], index: 1, kind: input, shape index: {}]   ;;  %s703_s2 = inlined_call_operand.hbm [shape: f32[16,640], index: 2, kind: input, shape index: {}]   ;;  %s704_s3 = inlined_call_operand.hbm [shape: f32[8,640], index: 3, kind: output, shape index: {}]  }
   0x1   :  { %8 = sst [smem:[#allocation2]] %s702_s1 }
   0x2   :  { %9 = vsyncpa [#allocation6], 0 }
   0x3   :  { %10 = vsyncpa [#allocation4], 0 }
   0x4   :  { %12 = vsyncpa [#allocation4 + $0x1], 0 }
   0x5   :  { %13 = vsyncpa [#allocation5], 0 }
   0x6   :  { %15 = vsyncpa [#allocation5 + $0x1], 0  ;;  %s529_s14 = smov 0   ;;  %s531_s15 = smov 0  }
   0x7   :  { %s533_s16 = smov 0   ;;  %s535_s17 = smov 0  }
   0x8 LB: > { %s550_s1 = sadd.s32 4294967295, %s498_s17   ;;  %s312_s18 = sadd.s32 4294967294, %s498_s17   ;;  %s498_s17 = sphi %s535_s17, %s725_s17   ;;  %s494_s16 = sphi %s533_s16, %s724_s16   ;;  %s490_s15 = sphi %s531_s15, %s723_s15   ;;  %s486_s14 = sphi %s529_s14, %s722_s14  }
   0x9   : > { %s554_s19 = sadd.s32 1, %s498_s17   ;;  %s70_s20 = sadd.s32 1, %s494_s16 }
   0xa   : > { %s67_s21 = ssub.s32 %s498_s17, %s554_s19  ;;  %p77_p0 = scmp.ne.s32.totalorder %s494_s16, %s490_s15 }
   0xb   : > { %p68_p1 = scmp.eq.s32.totalorder %s67_s21, 0  ;;  %p78_p2 = scmp.eq.s32.totalorder %s498_s17, 0 }
   0xc   : > { %p83_p3 = scmp.ne.s32.totalorder %s490_s15, %s486_s14  ;;  %p706_p4 = scmp.eq.s32.totalorder %s550_s1, 0 }
   0xd   : > { %s566_s22 = scalar_select %p68_p1, %s494_s16, %s70_s20  }
   0xe   : > { %p568_p5 = por %p78_p2, %p77_p0  ;;  %p574_p6 = por %p706_p4, %p83_p3 }
   0xf   : > { %p107_p7 = scmp.eq.s32.totalorder %s550_s1, 4  ;;  %p113_p8 = scmp.eq.s32.totalorder %s312_s18, 4 }
  0x10   : > { %s710_s24 = scalar_select %p574_p6, 1, 0 }
  0x11   : > { %p313_p9 = scmp.ge.s32.totalorder %s498_s17, 1  ;;  %p120_p10 = scmp.lt.s32.totalorder %s498_s17, 6 }
  0x12   : > { %p581_p11 = por %p107_p7, %p77_p0  ;;  %p585_p12 = por %p113_p8, %p83_p3 }
  0x13   : > { %p589_p13 = pnand %p313_p9, %p120_p10  ;;  %s133_s30 = sshll.u32 %s701_s0, 4  ;;  %s134_s30 = int_to_ptr.vmem [resolvable:$true] %s133_s30 }
  0x14   : > { %s711_s25 = scalar_select %p581_p11, 1, 0 }
  0x15   : > { %s712_s26 = scalar_select %p585_p12, 1, 0 }
  0x16   : > { %s713_s27 = scalar_select %p589_p13, 1, 0 }
  0x17   : > { %p335_p1 = pneg %p589_p13  ;;  %p348_p0 = scmp.lt.s32.totalorder %s498_s17, 5 }
  0x18   : > { %s147_s5 = sand.u32 1, %s494_s16   ;;  %s387_s8 = scalar_lea.vmem %s134_s30, 16 }
  0x19   : > { %p601_p2 = pnand %p335_p1, %p706_p4  ;;  %p608_p3 = pnand %p348_p0, %p568_p5 }
  0x1a   : > { %s316_s7 = sshll.u32 %s147_s5, 4  ;;  %p388_p7 = scmp.ne.s32.totalorder %s134_s30, %s387_s8 }
  0x1b   : > { %p389_p8 = pneg %p601_p2  ;;  %p395_p12 = scmp.lt.s32.totalorder %s134_s30, %s134_s30 }
  0x1c   : > { %p396_p11 = scmp.lt.s32.totalorder %s387_s8, %s387_s8 }
  0x1d   : > { %p390_p9 = pnand %p389_p8, %p388_p7 }
  0x1e   : > { %p397_p1 = por %p396_p11, %p395_p12 }
  0x1f   : > { %p391_p10 = pneg %p390_p9 }
  0x21   : > { %p398_p4 = pnand %p397_p1, %p391_p10 }
  0x23   : > { %401 = shalt.err (!%p398_p4)
}
  0x24   : > { %s500_s9 = smov [#allocation3]   ;;  %s317_s10 = sshll.u32 %s498_s17, 7 }
  0x25   : > { %338 = dma.vmem_to_smem (!%p601_p2), %s134_s30, 16, %s500_s9, [#allocation6]  }
  0x26   : > { %s151_s11 = scalar_lea.vmem [#allocation7], %s316_s7  ;;  %s620_s20 = scalar_lea.hbm %s703_s2, %s317_s10 }
  0x27   : > { %s157_s12 = sshll.u32 %s151_s11, 4  ;;  %s624_s21 = scalar_lea.sflag [#allocation4], %s147_s5  ;;  %s622_s12 = int_to_ptr.vmem [resolvable:$true] %s157_s12 }
  0x28   : > { %s402_s23 = scalar_lea.hbm %s620_s20, 256  ;;  %p404_p5 = pneg %p608_p3 }
  0x29   : > { %p403_p4 = scmp.ne.s32.totalorder %s620_s20, %s402_s23  ;;  %s407_s30 = scalar_lea.hbm %s703_s2, 1280 }
  0x2a   : > { %p408_p0 = scmp.lt.s32.totalorder %s620_s20, %s703_s2  ;;  %p409_p2 = scmp.lt.s32.totalorder %s407_s30, %s402_s23 }
  0x2b   : > { %p405_p11 = pnand %p404_p5, %p403_p4 }
  0x2c   : > { %p410_p7 = por %p409_p2, %p408_p0 }
  0x2d   : > { %p406_p12 = pneg %p405_p11 }
  0x2f   : > { %p411_p8 = pnand %p410_p7, %p406_p12 }
  0x31   : > { %414 = shalt.err (!%p411_p8)
}
  0x32   : > { %s415_s5 = scalar_lea.vmem %s622_s12, 256  ;;  %s501_s8 = smov [#allocation7]  }
  0x33   : > { %p416_p9 = scmp.ne.s32.totalorder %s622_s12, %s415_s5  ;;  %s420_s9 = sshll.u32 %s501_s8, 4  ;;  %s421_s9 = int_to_ptr.vmem [resolvable:$false] %s420_s9 }
  0x34   : > { %s422_s10 = scalar_lea.vmem %s421_s9, 512  ;;  %p423_p4 = scmp.lt.s32.totalorder %s622_s12, %s421_s9 }
  0x35   : > { %p418_p10 = pnand %p416_p9, %p404_p5  ;;  %p424_p11 = scmp.lt.s32.totalorder %s422_s10, %s415_s5 }
  0x37   : > { %p419_p1 = pneg %p418_p10  ;;  %p425_p6 = por %p424_p11, %p423_p4 }
  0x39   : > { %p426_p13 = pnand %p425_p6, %p419_p1 }
  0x3b   : > { %429 = shalt.err (!%p426_p13)
}
  0x3c   : > { %s502_s11 = smov 640   ;;  %s503_s13 = smov 128  }
  0x3d   : > { %s504_s18 = smov 8   ;;  %p716_p5 = scmp.ne.s32.totalorder %s713_s27, 0 }
  0x3e   : > { %342 = dma.hbm_to_vmem [thread:$0]  (!%p608_p3), %s620_s20, 256, %s622_s12, %s624_s21, %s502_s11, %s503_s13, %s504_s18  }
  0x3f   : > { %169 = sbr.rel (%p716_p5) target bundleno = 102 (0x66), region = 32  ;;  %p717_p12 = scmp.eq.s32.totalorder (!%p716_p5), %s550_s1, 0 }
  0x44   : > { %473 = dma.done.wait (%p717_p12), [#allocation6], 16   ;;  %p718_p0 = pmov %p717_p12 }
  0x45   : > { %s652_s23 = sand.u32 1, %s490_s15   ;;  %p719_p6 = scmp.ne.s32.totalorder %s710_s24, 0 }
  0x46   : > { %475 = vsyncadd (%p718_p0), [#allocation6], 4294967280  ;;  %s320_s28 = sshll.u32 %s652_s23, 4  ;;  %s176_s29 = scalar_lea.sflag [#allocation4], %s652_s23 }
  0x47   : > { %s179_s30 = scalar_lea.vmem [#allocation7], %s320_s28 }
  0x48   : > { %477 = dma.done.wait (%p719_p6), %s176_s29, 256  }
  0x49   : > { %479 = vsyncadd (%p719_p6), %s176_s29, 4294967040 }
  0x4a   : > { %184 = sfence }
  0x4b   : > { %s203_s27 = sld [smem:[#allocation3]]  ;;  %s321_s12 = sshll.u32 %s652_s23, 3  ;;  %v206_v0 = vld [vmem:[%s179_s30] sm:$0xff]  ;;  %v207_v1 = vld [vmem:[%s179_s30 + $0x8] sm:$0xff] }
  0x4c   : > { %s322_s6 = sld [smem:[#allocation3 + $0x1]]  ;;  %s202_s21 = scalar_lea.vmem [#allocation8], %s321_s12 }
  0x4d   : > { %s205_s20 = sld [smem:[#allocation2]]  ;;  %s230_s4 = sshll.u32 %s202_s21, 4  ;;  %s662_s4 = int_to_ptr.vmem [resolvable:$true] %s230_s4 }
  0x4e   : > { %s324_s24 = sshll.u32 %s550_s1, 7  ;;  %s217_s9 = scalar_lea.sflag [#allocation5], %s652_s23 }
  0x4f   : > { %s228_s8 = scalar_lea.hbm %s704_s3, %s324_s24  ;;  %s430_s10 = scalar_lea.vmem %s662_s4, 128 }
  0x50   : > { %p431_p13 = scmp.ne.s32.totalorder %s662_s4, %s430_s10  ;;  %p720_p3 = scmp.ne.s32.totalorder %s711_s25, 0 }
  0x51   : > { %v208_v2 = vstv %s203_s27  ;;  %s505_s11 = smov [#allocation8]  }
  0x52   : > { %v209_v3 = vmul.f32 %v208_v2, %v206_v0  ;;  %v210_v4 = vstv %s322_s6  ;;  %p432_p2 = pnand %p431_p13, %p720_p3  ;;  %s434_s1 = sshll.u32 %s505_s11, 4  ;;  %s435_s1 = int_to_ptr.vmem [resolvable:$false] %s434_s1 }
  0x53   : > { %v211_v5 = vmul.f32 %v210_v4, %v207_v1  ;;  %v213_v6 = vstv %s205_s20  ;;  %s436_s13 = scalar_lea.vmem %s435_s1, 256  ;;  %p437_p8 = scmp.lt.s32.totalorder %s662_s4, %s435_s1 }
  0x54   : > { %p433_p7 = pneg %p432_p2  ;;  %p438_p9 = scmp.lt.s32.totalorder %s436_s13, %s430_s10 }
  0x55   : > { %v212_v7 = vadd.f32 %v211_v5, %v209_v3 }
  0x56   : > { %p439_p10 = por %p438_p9, %p437_p8 }
  0x57   : > { %v214_v8 = vadd.f32 %v213_v6, %v212_v7 }
  0x58   : > { %p440_p1 = pnand %p439_p10, %p433_p7 }
  0x59   : > { %215 = vst [vmem:[%s202_s21] sm:$0xff] %v214_v8 }
  0x5a   : > { %443 = shalt.err (!%p440_p1)
}
  0x5b   : > { %s444_s18 = scalar_lea.hbm %s228_s8, 128  ;;  %s448_s29 = scalar_lea.hbm %s704_s3, 640 }
  0x5c   : > { %p445_p4 = scmp.ne.s32.totalorder %s228_s8, %s444_s18  ;;  %p449_p12 = scmp.lt.s32.totalorder %s228_s8, %s704_s3 }
  0x5d   : > { %p450_p0 = scmp.lt.s32.totalorder %s448_s29, %s444_s18 }
  0x5e   : > { %p446_p11 = pnand %p445_p4, %p720_p3 }
  0x5f   : > { %p451_p6 = por %p450_p0, %p449_p12 }
  0x60   : > { %p447_p5 = pneg %p446_p11 }
  0x62   : > { %p452_p13 = pnand %p451_p6, %p447_p5 }
  0x64   : > { %455 = shalt.err (!%p452_p13)
}
  0x65   : > { %333 = dma.vmem_to_hbm [thread:$0]  (%p720_p3), %s662_s4, 128, %s228_s8, %s217_s9  }
  0x66 PF: > { %p350_p2 = scmp.ge.s32.totalorder %s498_s17, 2  ;;  %s242_s6 = sand.u32 1, %s486_s14  }
  0x67   : > { %p721_p7 = scmp.ne.s32.totalorder %s712_s26, 0  ;;  %s243_s12 = scalar_lea.sflag [#allocation5], %s242_s6 }
  0x69   : > { %p344_p8 = pnand %p350_p2, %p721_p7 }
  0x6b   : > { %p345_p9 = pneg %p344_p8 }
  0x6d   : > { %481 = dma.done.wait (%p345_p9), %s243_s12, 128  }
  0x6e   : > { %483 = vsyncadd (%p345_p9), %s243_s12, 4294967168  ;;  %p18_p10 = scmp.ge.s32.totalorder %s554_s19, 7   ;;  %s722_s14 = smov %s490_s15 }
  0x6f   : > { %s723_s15 = smov %s494_s16  ;;  %s724_s16 = smov %s566_s22 }
  0x70   : > { %s725_s17 = smov %s554_s19  ;;  %20 = sbr.rel (!%p18_p10) target bundleno = 8 (0x8), region = 82 }
  0x75   :  { %248 = vsyncpa [#allocation4], 1 }
  0x76   :  { %250 = vsyncpa [#allocation4 + $0x1], 1 }
  0x77   :  { %251 = vsyncpa [#allocation5], 1 }
  0x78   :  { %253 = vsyncpa [#allocation5 + $0x1], 1 }
  0x79   :  { %254 = vsyncpa [#allocation6], 1 }
  0x7a   :  { %256 = vsyncpa [#allocation6 + $0x1], 1 }

</bundles_post_ra>
